<compile_context>
chip_gen: v7x
topology: tpu7x:2x2x1
jax: 0.10.0
libtpu: 0.0.40
codegen_flags: <defaults>
</compile_context>

<pallas_src>
import functools
import math

import jax
import jax.numpy as jnp
from jax import lax
from jax.experimental import pallas as pl
from jax.experimental.pallas import tpu as pltpu

D_IN = 80      # Linear in_features (fixed by the module)
D_ATT = 256    # Linear out_features
SCALE = math.sqrt(D_ATT)
EPS = 1e-6


def _round_up(x, m):
    return (x + m - 1) // m * m


def _time_weight_kernel(xt_ref, xbar_ref, wk_ref, bk_ref, wq_ref, bq_ref, tw_ref,
                        *, t, t_pad, tq, score_dtype):
    """One (batch, query-tile) step: un-normalized attention time weights.

    xt_ref:   (t_pad, 80)   frames x features (resident across query tiles)
    xbar_ref: (1, t_pad)    per-frame feature mean of x (f32)
    wk/wq:    (80, 256)     pre-transposed projection weights (resident)
    bk/bq:    (1, 256)      biases (f32)
    tw_ref:   (tq, 1)       output: time weight for this tile's frames
    """
    qi = pl.program_id(1)

    xt = xt_ref[...]                                                    # (t_pad, 80)

    # "query"-side projection of ALL frames (columns of the score block).
    qf = jnp.dot(xt, wq_ref[...], preferred_element_type=jnp.float32) + bq_ref[...]

    # "key"-side projection of only this tile's frames (rows of the score block).
    row0 = pl.multiple_of(qi * tq, tq)
    xrow = xt_ref[pl.ds(row0, tq), :]                                   # (tq, 80)
    kr = jnp.dot(xrow, wk_ref[...], preferred_element_type=jnp.float32) + bk_ref[...]

    # Scaled scores on the MXU (bf16 operands by default, f32 accumulation).
    s = lax.dot_general(kr.astype(score_dtype), qf.astype(score_dtype),
                        (((1,), (1,)), ((), ())),
                        preferred_element_type=jnp.float32) * (1.0 / SCALE)   # (tq, t_pad)

    if t_pad > t:
        # Mask zero-padded key frames out of the softmax (static branch).
        key_valid = lax.broadcasted_iota(jnp.int32, (1, t_pad), 1) < t
        s = jnp.where(key_valid, s, -1e30)

    # Softmax numerator only; normalization is deferred (rows of A sum to 1):
    #   tw = mean_d(A @ xt) = A @ xbar = (P @ xbar) / rowsum(P)
    # -> no (T,T) normalized-A slab and no (T,T)x(T,80) context matmul.
    s = s - jnp.max(s, axis=-1, keepdims=True)
    p = jnp.exp(s)                                                      # (tq, t_pad)
    num = jnp.sum(p * xbar_ref[...], axis=-1, keepdims=True)            # (tq, 1)
    den = jnp.sum(p, axis=-1, keepdims=True)                            # (tq, 1)
    tw_ref[...] = num / den


def time_self_att_weight(x, wk, bk, wq, bq, *, tq=256, use_bf16_matmul=True):
    """x: (B, 80, T); wk/wq: (256, 80); bk/bq: (256,).  Returns (B, 80, T)."""
    B, D, T = x.shape
    assert D == D_IN and T >= 1

    # ---- query-tile / padding geometry --------------------------------------
    if T > tq:
        tq_eff = tq
        t_pad = _round_up(T, tq_eff)
    else:
        t_pad = _round_up(T, 8)
        tq_eff = t_pad
    nq = t_pad // tq_eff

    compute_dtype = jnp.bfloat16 if use_bf16_matmul else jnp.float32

    # ---- layout plumbing in XLA (hoisted out of the kernel) ------------------
    xt = jnp.swapaxes(x, 1, 2)                        # (B, T, 80)
    xbar = jnp.mean(x, axis=1, keepdims=True)         # (B, 1, T) per-frame feature mean (f32)
    if t_pad != T:
        xt = jnp.pad(xt, ((0, 0), (0, t_pad - T), (0, 0)))
        xbar = jnp.pad(xbar, ((0, 0), (0, 0), (0, t_pad - T)))
    xt = xt.astype(compute_dtype)

    wk_t = wk.T.astype(compute_dtype)                 # (80, 256), lane-dense 256 output
    wq_t = wq.T.astype(compute_dtype)
    bk_r = bk.reshape(1, D_ATT).astype(jnp.float32)
    bq_r = bq.reshape(1, D_ATT).astype(jnp.float32)

    kernel = functools.partial(_time_weight_kernel, t=T, t_pad=t_pad,
                               tq=tq_eff, score_dtype=compute_dtype)

    # Explicit VMEM budget (defaults: v5e 16 MiB, v6e/v7x 32 MiB scoped).
    isz = jnp.dtype(compute_dtype).itemsize
    vmem_est = int(1.5 * (
        2 * t_pad * D_IN * isz                 # xt block (double-buffered)
        + 2 * t_pad * 4                        # xbar block
        + (t_pad + tq_eff) * D_ATT * 4         # f32 projections
        + (t_pad + tq_eff) * D_ATT * isz       # bf16 copies fed to the MXU
        + 2 * tq_eff * t_pad * 4               # scores + exp(scores)
        + 2 * D_IN * D_ATT * isz + 2 * D_ATT * 4
        + 4 * tq_eff * 4)) + (2 << 20)
    vmem_limit = max(32 << 20, min(100 << 20, vmem_est))
    # TODO(synk): for extremely long utterances (where a (tq, T) score block no
    # longer fits VMEM, esp. v7x's 64 MiB) add key tiling with an online softmax.

    tw_pad = pl.pallas_call(
        kernel,
        out_shape=jax.ShapeDtypeStruct((B, t_pad, 1), jnp.float32),
        grid_spec=pltpu.PrefetchScalarGridSpec(
            num_scalar_prefetch=0,
            grid=(B, nq),
            in_specs=[
                pl.BlockSpec((None, t_pad, D_IN), lambda b, q: (b, 0, 0)),  # xt[b] (resident across q)
                pl.BlockSpec((None, 1, t_pad), lambda b, q: (b, 0, 0)),     # xbar[b]
                pl.BlockSpec((D_IN, D_ATT), lambda b, q: (0, 0)),           # Wk^T (resident)
                pl.BlockSpec((1, D_ATT), lambda b, q: (0, 0)),              # bk
                pl.BlockSpec((D_IN, D_ATT), lambda b, q: (0, 0)),           # Wq^T (resident)
                pl.BlockSpec((1, D_ATT), lambda b, q: (0, 0)),              # bq
            ],
            out_specs=pl.BlockSpec((None, tq_eff, 1), lambda b, q: (b, q, 0)),
        ),
        compiler_params=pltpu.CompilerParams(
            # batch and query-tile axes are independent -> shard across the
            # 2 TCs on v7x even at B=1; harmless on v5e/v6e.
            dimension_semantics=("parallel", "parallel"),
            vmem_limit_bytes=vmem_limit,
        ),
    )(xt, xbar, wk_t, bk_r, wq_t, bq_r)

    # ---- tiny O(B*T) tail in plain XLA: min/max normalize + broadcast mul ----
    tw = tw_pad[:, :T, 0]                              # (B, T)
    mi = jnp.min(tw, axis=1, keepdims=True)
    ma = jnp.max(tw, axis=1, keepdims=True)
    # NOTE: like the PyTorch module, (ma - mi) == 0 (e.g. T == 1) yields inf/nan.
    twn = (tw - mi) / (ma - mi) + EPS                  # (B, T)
    return x * twn[:, None, :]                         # (B, 80, T)


def time_self_att_weight_ref(x, wk, bk, wq, bq):
    # Pure-JAX reference mirroring the PyTorch forward.
    xt = jnp.swapaxes(x, 1, 2)                                   # (B, T, D)
    k = jnp.einsum('btd,cd->btc', xt, wk) + bk                   # (B, T, 256)
    q = jnp.einsum('btd,cd->btc', xt, wq) + bq                   # (B, T, 256)
    s = jnp.einsum('btc,bsc->bts', k, q) / SCALE                 # (B, T, T)
    a = jax.nn.softmax(s, axis=2)
    c = jnp.einsum('bts,bsd->btd', a, xt)                        # (B, T, D)
    tw = jnp.swapaxes(jnp.mean(c, axis=2, keepdims=True), 1, 2)  # (B, 1, T)
    mi = jnp.min(tw, axis=2, keepdims=True)
    ma = jnp.max(tw, axis=2, keepdims=True)
    twn = (tw - mi) / (ma - mi) + EPS
    return x * twn


if __name__ == "__main__":
    key = jax.random.PRNGKey(0)
    kx, kwk, kbk, kwq, kbq = jax.random.split(key, 5)

    B, T = 2, 16                                  # small synthetic (B, 80, T) feature batch
    bound = 1.0 / math.sqrt(D_IN)                 # PyTorch nn.Linear default init range
    x = jax.random.normal(kx, (B, D_IN, T), dtype=jnp.float32)
    wk = jax.random.uniform(kwk, (D_ATT, D_IN), jnp.float32, -bound, bound)
    bk = jax.random.uniform(kbk, (D_ATT,), jnp.float32, -bound, bound)
    wq = jax.random.uniform(kwq, (D_ATT, D_IN), jnp.float32, -bound, bound)
    bq = jax.random.uniform(kbq, (D_ATT,), jnp.float32, -bound, bound)

    y_ref = time_self_att_weight_ref(x, wk, bk, wq, bq)

    # Exact-precision path (f32 MXU operands): validates module semantics tightly.
    y32 = time_self_att_weight(x, wk, bk, wq, bq, use_bf16_matmul=False)
    jax.block_until_ready(y32)
    assert y32.shape == (B, D_IN, T) and y32.dtype == jnp.float32
    err32 = float(jnp.max(jnp.abs(y32 - y_ref)))
    assert jnp.allclose(y32, y_ref, atol=5e-4, rtol=5e-4), \
        f"f32 path mismatch vs reference, max abs err {err32}"

    # Default fast path (bf16 MXU operands, f32 accumulation).  The min/max
    # normalization amplifies small absolute errors when the time-weight spread
    # is small (tiny test T), so the tolerance is loose by construction.
    y = time_self_att_weight(x, wk, bk, wq, bq)
    jax.block_until_ready(y)
    assert y.shape == (B, D_IN, T) and y.dtype == jnp.float32
    errbf = float(jnp.max(jnp.abs(y - y_ref)))
    assert jnp.allclose(y, y_ref, atol=1e-1, rtol=1e-1), \
        f"bf16 path mismatch vs reference, max abs err {errbf}"

    print("KERNEL_OK")
</pallas_src>

<mosaic_0001>
module attributes {stable_mosaic.version = 11 : i64} {
  func.func @_time_weight_kernel(%arg0: i32, %arg1: i32, %arg2: memref<1x16x80xf32, #tpu.memory_space<vmem>>, %arg3: memref<1x1x16xf32, #tpu.memory_space<vmem>>, %arg4: memref<80x256xf32, #tpu.memory_space<vmem>>, %arg5: memref<1x256xf32, #tpu.memory_space<vmem>>, %arg6: memref<80x256xf32, #tpu.memory_space<vmem>>, %arg7: memref<1x256xf32, #tpu.memory_space<vmem>>, %arg8: memref<1x16x1xf32, #tpu.memory_space<vmem>>) attributes {dimension_semantics = [#tpu.dimension_semantics<parallel>, #tpu.dimension_semantics<parallel>], iteration_bounds = array<i64: 2, 1>, scalar_prefetch = 0 : i64, scratch_operands = 0 : i64, tpu.core_type = #tpu.core_type<tc>, window_params = [{transform_indices = @transform_0, window_bounds = array<i64: 1, 16, 80>}, {transform_indices = @transform_1, window_bounds = array<i64: 1, 1, 16>}, {pipeline_mode = #tpu.pipeline_mode<synchronous>, transform_indices = @transform_2, window_bounds = array<i64: 80, 256>}, {pipeline_mode = #tpu.pipeline_mode<synchronous>, transform_indices = @transform_3, window_bounds = array<i64: 1, 256>}, {pipeline_mode = #tpu.pipeline_mode<synchronous>, transform_indices = @transform_4, window_bounds = array<i64: 80, 256>}, {pipeline_mode = #tpu.pipeline_mode<synchronous>, transform_indices = @transform_5, window_bounds = array<i64: 1, 256>}, {transform_indices = @transform_6, window_bounds = array<i64: 1, 16, 1>}]} {
    %c0 = arith.constant 0 : index
    %c0_0 = arith.constant 0 : index
    %c0_1 = arith.constant 0 : index
    %0 = vector.load %arg2[%c0, %c0_0, %c0_1] : memref<1x16x80xf32, #tpu.memory_space<vmem>>, vector<1x16x80xf32>
    %1 = vector.shape_cast %0 : vector<1x16x80xf32> to vector<16x80xf32>
    %c0_2 = arith.constant 0 : index
    %c0_3 = arith.constant 0 : index
    %2 = vector.load %arg6[%c0_2, %c0_3] : memref<80x256xf32, #tpu.memory_space<vmem>>, vector<80x256xf32>
    %cst = arith.constant dense<0.000000e+00> : vector<16x256xf32>
    %3 = tpu.matmul %1, %2, %cst {dimension_numbers = #tpu.dot_dimension_numbers<[1], [0], [0], [1], [0, 0, 1, 1], [], []>} : vector<16x80xf32>, vector<80x256xf32>, vector<16x256xf32> -> vector<16x256xf32>
    %c0_4 = arith.constant 0 : index
    %c0_5 = arith.constant 0 : index
    %4 = vector.load %arg7[%c0_4, %c0_5] : memref<1x256xf32, #tpu.memory_space<vmem>>, vector<1x256xf32>
    %5 = vector.broadcast %4 : vector<1x256xf32> to vector<16x256xf32>
    %6 = arith.addf %3, %5 : vector<16x256xf32>
    %c16_i32 = arith.constant 16 : i32
    %7 = arith.muli %arg1, %c16_i32 : i32
    %8 = tpu.assume_multiple %7, 16 : i32
    %c0_6 = arith.constant 0 : index
    %9 = arith.index_cast %8 : i32 to index
    %c0_7 = arith.constant 0 : index
    %10 = vector.load %arg2[%c0_6, %9, %c0_7] : memref<1x16x80xf32, #tpu.memory_space<vmem>>, vector<1x16x80xf32>
    %11 = vector.shape_cast %10 : vector<1x16x80xf32> to vector<16x80xf32>
    %c0_8 = arith.constant 0 : index
    %c0_9 = arith.constant 0 : index
    %12 = vector.load %arg4[%c0_8, %c0_9] : memref<80x256xf32, #tpu.memory_space<vmem>>, vector<80x256xf32>
    %cst_10 = arith.constant dense<0.000000e+00> : vector<16x256xf32>
    %13 = tpu.matmul %11, %12, %cst_10 {dimension_numbers = #tpu.dot_dimension_numbers<[1], [0], [0], [1], [0, 0, 1, 1], [], []>} : vector<16x80xf32>, vector<80x256xf32>, vector<16x256xf32> -> vector<16x256xf32>
    %c0_11 = arith.constant 0 : index
    %c0_12 = arith.constant 0 : index
    %14 = vector.load %arg5[%c0_11, %c0_12] : memref<1x256xf32, #tpu.memory_space<vmem>>, vector<1x256xf32>
    %15 = vector.broadcast %14 : vector<1x256xf32> to vector<16x256xf32>
    %16 = arith.addf %13, %15 : vector<16x256xf32>
    %cst_13 = arith.constant dense<0.000000e+00> : vector<16x16xf32>
    %17 = tpu.matmul %16, %6, %cst_13 {dimension_numbers = #tpu.dot_dimension_numbers<[1], [1], [0], [0], [0, 0, 1, 0], [], []>} : vector<16x256xf32>, vector<16x256xf32>, vector<16x16xf32> -> vector<16x16xf32>
    %cst_14 = arith.constant 6.250000e-02 : f32
    %18 = vector.broadcast %cst_14 : f32 to vector<16x16xf32>
    %19 = arith.mulf %17, %18 : vector<16x16xf32>
    %cst_15 = arith.constant dense<0xFF800000> : vector<16xf32>
    %20 = vector.multi_reduction <maximumf>, %19, %cst_15 [1] : vector<16x16xf32> to vector<16xf32>
    %21 = vector.shape_cast %20 : vector<16xf32> to vector<16x1xf32>
    %22 = vector.broadcast %21 : vector<16x1xf32> to vector<16x16xf32>
    %23 = arith.subf %19, %22 : vector<16x16xf32>
    %24 = math.exp %23 : vector<16x16xf32>
    %c0_16 = arith.constant 0 : index
    %c0_17 = arith.constant 0 : index
    %c0_18 = arith.constant 0 : index
    %25 = vector.load %arg3[%c0_16, %c0_17, %c0_18] : memref<1x1x16xf32, #tpu.memory_space<vmem>>, vector<1x1x16xf32>
    %26 = vector.shape_cast %25 : vector<1x1x16xf32> to vector<1x16xf32>
    %27 = vector.broadcast %26 : vector<1x16xf32> to vector<16x16xf32>
    %28 = arith.mulf %24, %27 : vector<16x16xf32>
    %cst_19 = arith.constant dense<0.000000e+00> : vector<16xf32>
    %29 = vector.multi_reduction <add>, %28, %cst_19 [1] : vector<16x16xf32> to vector<16xf32>
    %30 = vector.shape_cast %29 : vector<16xf32> to vector<16x1xf32>
    %cst_20 = arith.constant dense<0.000000e+00> : vector<16xf32>
    %31 = vector.multi_reduction <add>, %24, %cst_20 [1] : vector<16x16xf32> to vector<16xf32>
    %32 = vector.shape_cast %31 : vector<16xf32> to vector<16x1xf32>
    %33 = arith.divf %30, %32 : vector<16x1xf32>
    %c0_21 = arith.constant 0 : index
    %c0_22 = arith.constant 0 : index
    %c0_23 = arith.constant 0 : index
    %34 = vector.load %arg8[%c0_21, %c0_22, %c0_23] : memref<1x16x1xf32, #tpu.memory_space<vmem>>, vector<1x16x1xf32>
    %35 = vector.shape_cast %34 : vector<1x16x1xf32> to vector<16x1xf32>
    %36 = vector.shape_cast %33 : vector<16x1xf32> to vector<1x16x1xf32>
    tpu.vector_store %arg8[%c0_21, %c0_22, %c0_23], %36 {strides = array<i32>} : memref<1x16x1xf32, #tpu.memory_space<vmem>>, vector<1x16x1xf32>,
    return
  }
  func.func @transform_0(%arg0: i32, %arg1: i32) -> (i32, i32, i32) {
    %c0_i32 = arith.constant 0 : i32
    %c0_i32_0 = arith.constant 0 : i32
    %c0_i32_1 = arith.constant 0 : i32
    return %arg0, %c0_i32, %c0_i32_0 : i32, i32, i32
  }
  func.func @transform_1(%arg0: i32, %arg1: i32) -> (i32, i32, i32) {
    %c0_i32 = arith.constant 0 : i32
    %c0_i32_0 = arith.constant 0 : i32
    %c0_i32_1 = arith.constant 0 : i32
    return %arg0, %c0_i32, %c0_i32_0 : i32, i32, i32
  }
  func.func @transform_2(%arg0: i32, %arg1: i32) -> (i32, i32) {
    %c0_i32 = arith.constant 0 : i32
    %c0_i32_0 = arith.constant 0 : i32
    %c0_i32_1 = arith.constant 0 : i32
    return %c0_i32, %c0_i32_0 : i32, i32
  }
  func.func @transform_3(%arg0: i32, %arg1: i32) -> (i32, i32) {
    %c0_i32 = arith.constant 0 : i32
    %c0_i32_0 = arith.constant 0 : i32
    %c0_i32_1 = arith.constant 0 : i32
    return %c0_i32, %c0_i32_0 : i32, i32
  }
  func.func @transform_4(%arg0: i32, %arg1: i32) -> (i32, i32) {
    %c0_i32 = arith.constant 0 : i32
    %c0_i32_0 = arith.constant 0 : i32
    %c0_i32_1 = arith.constant 0 : i32
    return %c0_i32, %c0_i32_0 : i32, i32
  }
  func.func @transform_5(%arg0: i32, %arg1: i32) -> (i32, i32) {
    %c0_i32 = arith.constant 0 : i32
    %c0_i32_0 = arith.constant 0 : i32
    %c0_i32_1 = arith.constant 0 : i32
    return %c0_i32, %c0_i32_0 : i32, i32
  }
  func.func @transform_6(%arg0: i32, %arg1: i32) -> (i32, i32, i32) {
    %c0_i32 = arith.constant 0 : i32
    %c0_i32_0 = arith.constant 0 : i32
    return %arg0, %arg1, %c0_i32 : i32, i32, i32
  }
}

</mosaic_0001>

<bundles_post_ra>
// kernel: tpu_custom_call.1
= control target key start
LH: loop header
LB: loop body
LE: loop exit
PB: predicated region body
PF: predicated region fallthrough
CT: control target
= control target key end

     0   :  { %11 = vsyncpa [#allocation3], 0  ;;  %s1378_s0 = inlined_call_operand.hbm [shape: f32[2,16,80], index: 0, kind: input, shape index: {}]   ;;  %s1379_s1 = inlined_call_operand.vmem [shape: f32[2,1,16], index: 1, kind: input, shape index: {}]   ;;  %s1380_s2 = inlined_call_operand.hbm [shape: f32[80,256], index: 2, kind: input, shape index: {}]   ;;  %s1381_s3 = inlined_call_operand.vmem [shape: f32[1,256], index: 3, kind: input, shape index: {}]   ;;  %s1382_s4 = inlined_call_operand.hbm [shape: f32[80,256], index: 4, kind: input, shape index: {}]   ;;  %s1383_s5 = inlined_call_operand.vmem [shape: f32[1,256], index: 5, kind: input, shape index: {}]   ;;  %s1384_s6 = inlined_call_operand.vmem [shape: f32[2,16,1], index: 6, kind: output, shape index: {}]  }
   0x1   :  { %13 = vsyncpa [#allocation3 + $0x1], 0 }
   0x2   :  { %14 = vsyncpa [#allocation5], 0  ;;  %s1159_s21 = smov 0   ;;  %s1161_s22 = smov 0  }
   0x3   :  { %s1163_s23 = smov 0   ;;  %s1165_s24 = smov 0  }
   0x4   :  { %s1167_s25 = smov 0   ;;  %s1169_s26 = smov 0  }
   0x5 LB: > { %s815_s27 = sadd.s32 4294967295, %s1114_s26   ;;  %p52_p0 = scmp.ne.s32.totalorder %s1098_s22, %s1094_s21  ;;  %s1114_s26 = sphi %s1169_s26, %s20_s26   ;;  %s1110_s25 = sphi %s1167_s25, %s1401_s25   ;;  %s1106_s24 = sphi %s1165_s24, %s1400_s24   ;;  %s1102_s23 = sphi %s1163_s23, %s1399_s23   ;;  %s1098_s22 = sphi %s1161_s22, %s1398_s22   ;;  %s1094_s21 = sphi %s1159_s21, %s1397_s21  }
   0x6   : > { %p1189_p1 = scmp.eq.s32.totalorder %s815_s27, 0  ;;  %p817_p2 = scmp.ge.s32.totalorder %s1114_s26, 1 }
   0x7   : > { %p201_p3 = scmp.lt.s32.totalorder %s1114_s26, 3  ;;  %s1116_s7 = smov [#allocation4]  }
   0x8   : > { %s1389_s28 = scalar_select %p1189_p1, 1, 0 }
   0x9   : > { %p1197_p4 = por %p1189_p1, %p52_p0  ;;  %p1201_p5 = pnand %p817_p2, %p201_p3 }
   0xa   : > { %s213_s8 = sshll.u32 %s1116_s7, 4  ;;  %s1117_s10 = smov [#allocation6]   ;;  %s214_s8 = int_to_ptr.vmem [resolvable:$true] %s213_s8 }
   0xb   : > { %s1390_s29 = scalar_select %p1197_p4, 1, 0 }
   0xc   : > { %s1391_s30 = scalar_select %p1201_p5, 1, 0 }
   0xd   : > { %p895_p6 = pneg %p1201_p5  ;;  %s229_s11 = sshll.u32 %s1117_s10, 4  ;;  %s1213_s11 = int_to_ptr.vmem [resolvable:$true] %s229_s11 }
   0xe   : > { %s974_s14 = scalar_lea.hbm %s1380_s2, 2560 }
   0xf   : > { %p1209_p7 = pnand %p895_p6, %p1189_p1  ;;  %p975_p8 = scmp.ne.s32.totalorder %s1380_s2, %s974_s14 }
  0x10   : > { %p981_p12 = scmp.lt.u32.totalorder %s974_s14, %s1380_s2 }
  0x11   : > { %p976_p9 = pneg %p1209_p7 }
  0x13   : > { %p977_p10 = pnand %p976_p9, %p975_p8 }
  0x15   : > { %p978_p11 = pneg %p977_p10 }
  0x17   : > { %p983_p13 = pnand %p981_p12, %p978_p11 }
  0x19   : > { %986 = shalt.err (!%p983_p13)
}
  0x1a   : > { %s987_s19 = scalar_lea.vmem %s214_s8, 2560  ;;  %p995_p6 = scmp.lt.s32.totalorder %s214_s8, %s214_s8 }
  0x1b   : > { %p988_p0 = scmp.ne.s32.totalorder %s214_s8, %s987_s19  ;;  %p996_p1 = scmp.lt.s32.totalorder %s987_s19, %s987_s19 }
  0x1d   : > { %p990_p2 = pnand %p988_p0, %p976_p9  ;;  %p997_p4 = por %p996_p1, %p995_p6 }
  0x1f   : > { %p991_p3 = pneg %p990_p2 }
  0x21   : > { %p998_p5 = pnand %p997_p4, %p991_p3 }
  0x23   : > { %1001 = shalt.err (!%p998_p5)
}
  0x24   : > { %s1118_s20 = smov 256   ;;  %s1119_s21 = smov 16  }
  0x25   : > { %898 = dma.hbm_to_vmem [thread:$0]  (!%p1209_p7), %s1380_s2, 2560, %s214_s8, [#allocation5], %s1118_s20, %s1118_s20, %s1119_s21  }
  0x26   : > { %s1002_s13 = scalar_lea.hbm %s1382_s4, 2560 }
  0x27   : > { %p1003_p8 = scmp.ne.s32.totalorder %s1382_s4, %s1002_s13  ;;  %p1009_p5 = scmp.lt.u32.totalorder %s1002_s13, %s1382_s4 }
  0x29   : > { %p1005_p1 = pnand %p1003_p8, %p976_p9 }
  0x2b   : > { %p1006_p4 = pneg %p1005_p1 }
  0x2d   : > { %p1011_p10 = pnand %p1009_p5, %p1006_p4 }
  0x2f   : > { %1014 = shalt.err (!%p1011_p10)
}
  0x30   : > { %s1015_s8 = scalar_lea.vmem %s1213_s11, 2560  ;;  %p1023_p0 = scmp.lt.s32.totalorder %s1213_s11, %s1213_s11 }
  0x31   : > { %p1016_p11 = scmp.ne.s32.totalorder %s1213_s11, %s1015_s8  ;;  %p1024_p2 = scmp.lt.s32.totalorder %s1015_s8, %s1015_s8 }
  0x33   : > { %p1018_p12 = pnand %p1016_p11, %p976_p9  ;;  %p1025_p3 = por %p1024_p2, %p1023_p0 }
  0x35   : > { %p1019_p13 = pneg %p1018_p12 }
  0x37   : > { %p1026_p6 = pnand %p1025_p3, %p1019_p13 }
  0x39   : > { %1029 = shalt.err (!%p1026_p6)
}
  0x3a   : > { %901 = dma.hbm_to_vmem [thread:$0]  (!%p1209_p7), %s1382_s4, 2560, %s1213_s11, [#allocation5], %s1118_s20, %s1118_s20, %s1119_s21  }
  0x3b   : > { %s32_s27 = sadd.s32 1, %s1110_s25  ;;  %s39_s7 = sadd.s32 1, %s1102_s23 }
  0x3c   : > { %p34_p9 = scmp.ge.s32.totalorder %s32_s27, 2  ;;  %p46_p8 = scmp.ne.s32.totalorder %s1102_s23, %s1098_s22 }
  0x3d   : > { %p47_p1 = scmp.eq.s32.totalorder %s1114_s26, 0  ;;  %p908_p4 = scmp.lt.s32.totalorder %s1114_s26, 2 }
  0x3e   : > { %s1403_s27 = smov (%p34_p9, %s32_s27), 0  ;;  %s246_s9 = sand.u32 1, %s1102_s23  }
  0x3f   : > { %p48_p5 = por %p47_p1, %p46_p8  ;;  %s36_s10 = ssub.s32 %s1110_s25, %s1403_s27 }
  0x40   : > { %p37_p10 = scmp.eq.s32.totalorder %s36_s10, 0  ;;  %s821_s12 = sshll.u32 %s246_s9, 4 }
  0x41   : > { %s837_s13 = sshll.u32 %s1110_s25, 8  ;;  %s250_s21 = scalar_lea.vmem [#allocation2], %s821_s12 }
  0x42   : > { %s1275_s14 = scalar_select %p37_p10, %s1102_s23, %s39_s7  }
  0x43   : > { %s1280_s20 = scalar_lea.hbm %s1378_s0, %s837_s13  ;;  %s257_s16 = sshll.u32 %s250_s21, 4  ;;  %s1282_s16 = int_to_ptr.vmem [resolvable:$true] %s257_s16 }
  0x44   : > { %p1286_p7 = pnand %p908_p4, %p48_p5  ;;  %s1290_s8 = scalar_lea.sflag [#allocation3], %s246_s9 }
  0x45   : > { %s1030_s18 = scalar_lea.hbm %s1280_s20, 256  ;;  %s1035_s10 = scalar_lea.hbm %s1378_s0, 512 }
  0x46   : > { %p1031_p11 = scmp.ne.s32.totalorder %s1280_s20, %s1030_s18  ;;  %p1032_p12 = pneg %p1286_p7 }
  0x47   : > { %p1036_p2 = scmp.lt.u32.totalorder %s1280_s20, %s1378_s0  ;;  %p1037_p3 = scmp.lt.u32.totalorder %s1035_s10, %s1030_s18 }
  0x48   : > { %p1033_p13 = pnand %p1032_p12, %p1031_p11  ;;  %p1039_p9 = scmp.lt.u32.totalorder %s1030_s18, %s1280_s20 }
  0x49   : > { %p1038_p6 = por %p1037_p3, %p1036_p2 }
  0x4a   : > { %p1034_p0 = pneg %p1033_p13 }
  0x4b   : > { %p1040_p8 = por %p1039_p9, %p1038_p6 }
  0x4d   : > { %p1041_p1 = pnand %p1040_p8, %p1034_p0 }
  0x4f   : > { %1044 = shalt.err (!%p1041_p1)
}
  0x50   : > { %s1045_s9 = scalar_lea.vmem %s1282_s16, 256  ;;  %s1120_s15 = smov [#allocation2]  }
  0x51   : > { %p1046_p4 = scmp.ne.s32.totalorder %s1282_s16, %s1045_s9  ;;  %s1050_s11 = sshll.u32 %s1120_s15, 4  ;;  %s1051_s11 = int_to_ptr.vmem [resolvable:$false] %s1050_s11 }
  0x52   : > { %s1052_s21 = scalar_lea.vmem %s1051_s11, 512  ;;  %p1053_p11 = scmp.lt.s32.totalorder %s1282_s16, %s1051_s11 }
  0x53   : > { %p1048_p5 = pnand %p1046_p4, %p1032_p12  ;;  %p1054_p13 = scmp.lt.s32.totalorder %s1052_s21, %s1045_s9 }
  0x55   : > { %p1049_p10 = pneg %p1048_p5  ;;  %p1055_p2 = por %p1054_p13, %p1053_p11 }
  0x57   : > { %p1056_p3 = pnand %p1055_p2, %p1049_p10 }
  0x59   : > { %1059 = shalt.err (!%p1056_p3)
}
  0x5a   : > { %s1121_s18 = smov 128   ;;  %s1122_s19 = smov 8  }
  0x5b   : > { %905 = dma.hbm_to_vmem [thread:$0]  (!%p1286_p7), %s1280_s20, 256, %s1282_s16, %s1290_s8, %s1121_s18, %s1121_s18, %s1122_s19  }
  0x5c   : > { %p1394_p12 = scmp.ne.s32.totalorder %s1391_s30, 0 }
  0x5d   : > { %s277_s7 = sand.u32 (!%p1394_p12), 1, %s1098_s22   ;;  %p1395_p0 = scmp.ne.s32.totalorder (!%p1394_p12), %s1390_s29, 0 }
  0x5e   : > { %275 = sbr.rel (%p1394_p12) target bundleno = 890 (0x37a), region = 44  ;;  %s1321_s10 = sshll.u32 (!%p1394_p12), %s277_s7, 4 }
  0x5f   : > { %s278_s12 = scalar_lea.sflag (!%p1394_p12), [#allocation3], %s277_s7  ;;  %s281_s13 = scalar_lea.vmem (!%p1394_p12), [#allocation2], %s1321_s10 }
  0x65   : > { %1085 = dma.done.wait (%p1395_p0), %s278_s12, 256  }
  0x66   : > { %1087 = vsyncadd (%p1395_p0), %s278_s12, 4294967040  ;;  %p1396_p6 = scmp.ne.s32.totalorder %s1389_s28, 0 }
  0x68   : > { %1089 = dma.done.wait (%p1396_p6), [#allocation5], 5120  }
  0x69   : > { %1091 = vsyncadd (%p1396_p6), [#allocation5], 4294962176  ;;  %v1123_v0 = vmov 0.0   ;;  %v341_v1 = vld [vmem:[#allocation6 + $0x8] sm:$0xff]  ;;  %v343_v2 = vld [vmem:[#allocation6 + $0x18] sm:$0xff]  ;;  %vm372_vm0 = vcmask 654336   ;;  %v362_v63 = vlaneseq }
  0x6a   : > { %443 = vmatprep.mubr.f32.mxu0 %v1123_v0  ;;  %562 = vmatprep.mubr.f32.mxu1 %v1123_v0  ;;  %v340_v3 = vld [vmem:[#allocation6] sm:$0xff]  ;;  %v839_v4 = vpack.c.bf16 %v343_v2, %v341_v1  ;;  %v342_v5 = vld [vmem:[#allocation6 + $0x10] sm:$0xff]  ;;  %v345_v6 = vld [vmem:[#allocation6 + $0x28] sm:$0xff]  ;;  %vm652_vm1 = vcmask 130048   ;;  %p325_p7 = scmp.lt.s32.totalorder %s1106_s24, 1  ;;  %vm690_vm2 = vcmask 7168  }
  0x6b   : > { %v347_v7 = vld [vmem:[#allocation6 + $0x38] sm:$0xff]  ;;  %v841_v8 = vpack.c.bf16 %v342_v5, %v340_v3  ;;  %v344_v10 = vld [vmem:[#allocation6 + $0x20] sm:$0xff]  ;;  %v346_v11 = vld [vmem:[#allocation6 + $0x30] sm:$0xff]  ;;  %v363_v1 = vshrl.u32 %v362_v63, 7 }
  0x6c   : > { %v843_v9 = vpack.c.bf16 %v347_v7, %v345_v6  ;;  %v349_v12 = vld [vmem:[#allocation6 + $0x48] sm:$0xff]  ;;  %840 = vmatprep.subr.bf16.mxu0 %v839_v4  ;;  %v351_v13 = vld [vmem:[#allocation6 + $0x58] sm:$0xff]  ;;  %v845_v14 = vpack.c.bf16 %v346_v11, %v344_v10  ;;  %v348_v15 = vld [vmem:[#allocation6 + $0x40] sm:$0xff]  ;;  %s1405_s24 = smov (!%p325_p7, %s1106_s24), 1 }
  0x6d   : > { %842 = vmatpush1.bf16.msra.mxu0 %v841_v8  ;;  %v461_v16 = vld [vmem:[#allocation4 + $0x8] sm:$0xff]  ;;  %v463_v17 = vld [vmem:[#allocation4 + $0x18] sm:$0xff]  ;;  %v847_v18 = vpack.c.bf16 %v351_v13, %v349_v12  ;;  %v350_v19 = vld [vmem:[#allocation6 + $0x50] sm:$0xff]  ;;  %v364_v2 = vsub.s32 0, %v363_v1  ;;  %v368_v4 = vsub.s32 1, %v363_v1  ;;  %s327_s8 = scalar_lea.vmem %s1379_s1, %s1405_s24  ;;  %s838_s9 = sshll.u32 %s1405_s24, 4 }
  0x6e   : > { %844 = vmatprep.subr.bf16.mxu0 %v843_v9  ;;  %v859_v20 = vpack.c.bf16 %v463_v17, %v461_v16  ;;  %v460_v21 = vld [vmem:[#allocation4] sm:$0xff]  ;;  %v462_v22 = vld [vmem:[#allocation4 + $0x10] sm:$0xff]  ;;  %v353_v23 = vld [vmem:[#allocation6 + $0x68] sm:$0xff]  ;;  %v849_v29 = vpack.c.bf16 %v350_v19, %v348_v15  ;;  %s336_s21 = scalar_lea.vmem %s1384_s6, %s838_s9 }
  0x6f   : > { %v355_v24 = vld [vmem:[#allocation6 + $0x78] sm:$0xff]  ;;  %v861_v25 = vpack.c.bf16 %v462_v22, %v460_v21  ;;  %v465_v26 = vld [vmem:[#allocation4 + $0x28] sm:$0xff]  ;;  %v352_v27 = vld [vmem:[#allocation6 + $0x60] sm:$0xff] }
  0x70   : > { %860 = vmatprep.subr.bf16.mxu1 %v859_v20  ;;  %v467_v28 = vld [vmem:[#allocation4 + $0x38] sm:$0xff]  ;;  %v354_v30 = vld [vmem:[#allocation6 + $0x70] sm:$0xff]  ;;  %v464_v32 = vld [vmem:[#allocation4 + $0x20] sm:$0xff]  ;;  %v851_v34 = vpack.c.bf16 %v355_v24, %v353_v23 }
  0x71   : > { %846 = vmatpush1.bf16.msra.mxu0 %v845_v14  ;;  %862 = vmatpush1.bf16.msra.mxu1 %v861_v25  ;;  %v863_v31 = vpack.c.bf16 %v467_v28, %v465_v26  ;;  %v466_v33 = vld [vmem:[#allocation4 + $0x30] sm:$0xff]  ;;  %v357_v35 = vld [vmem:[#allocation6 + $0x88] sm:$0xff]  ;;  %v471_v38 = vld [vmem:[#allocation4 + $0x58] sm:$0xff]  ;;  %v853_v45 = vpack.c.bf16 %v354_v30, %v352_v27 }
  0x72   : > { %848 = vmatprep.subr.bf16.mxu0 %v847_v18  ;;  %v865_v36 = vpack.c.bf16 %v466_v33, %v464_v32  ;;  %v469_v37 = vld [vmem:[#allocation4 + $0x48] sm:$0xff]  ;;  %v359_v39 = vld [vmem:[#allocation6 + $0x98] sm:$0xff]  ;;  %v468_v41 = vld [vmem:[#allocation4 + $0x40] sm:$0xff] }
  0x73   : > { %864 = vmatprep.subr.bf16.mxu1 %v863_v31  ;;  %v867_v40 = vpack.c.bf16 %v471_v38, %v469_v37  ;;  %v470_v42 = vld [vmem:[#allocation4 + $0x50] sm:$0xff]  ;;  %v473_v43 = vld [vmem:[#allocation4 + $0x68] sm:$0xff]  ;;  %v475_v44 = vld [vmem:[#allocation4 + $0x78] sm:$0xff]  ;;  %v855_v48 = vpack.c.bf16 %v359_v39, %v357_v35 }
  0x74   : > { %v356_v46 = vld [vmem:[#allocation6 + $0x80] sm:$0xff]  ;;  %v869_v47 = vpack.c.bf16 %v470_v42, %v468_v41  ;;  %v358_v49 = vld [vmem:[#allocation6 + $0x90] sm:$0xff]  ;;  %v871_v50 = vpack.c.bf16 %v475_v44, %v473_v43  ;;  %v477_v53 = vld [vmem:[#allocation4 + $0x88] sm:$0xff] }
  0x75   : > { %850 = vmatpush1.bf16.msra.mxu0 %v849_v29  ;;  %866 = vmatpush1.bf16.msra.mxu1 %v865_v36  ;;  %v472_v51 = vld [vmem:[#allocation4 + $0x60] sm:$0xff]  ;;  %v474_v52 = vld [vmem:[#allocation4 + $0x70] sm:$0xff]  ;;  %v479_v54 = vld [vmem:[#allocation4 + $0x98] sm:$0xff]  ;;  %v857_v55 = vpack.c.bf16 %v358_v49, %v356_v46 }
  0x76   : > { %852 = vmatprep.subr.bf16.mxu0 %v851_v34  ;;  %868 = vmatprep.subr.bf16.mxu1 %v867_v40  ;;  %v873_v56 = vpack.c.bf16 %v474_v52, %v472_v51  ;;  %v875_v57 = vpack.c.bf16 %v479_v54, %v477_v53  ;;  %v476_v58 = vld [vmem:[#allocation4 + $0x80] sm:$0xff]  ;;  %v478_v59 = vld [vmem:[#allocation4 + $0x90] sm:$0xff]  ;;  %v339_v62 = vld [vmem:[%s281_s13 + $0x8] sm:$0xff] }
  0x77   : > { %v338_v60 = vld [vmem:[%s281_s13] sm:$0xff]  ;;  %v877_v61 = vpack.c.bf16 %v478_v59, %v476_v58 }
  0x78   : > { %v360_v3 = vld [vmem:[%s1383_s5] sm:$0x3] }
  0x79   : > { %854 = vmatpush1.bf16.msra.mxu0 %v853_v45  ;;  %870 = vmatpush1.bf16.msra.mxu1 %v869_v47  ;;  %v480_v5 = vld [vmem:[%s1381_s3] sm:$0x3]  ;;  %v365_v7 = vrot.slane %v360_v3, %v364_v2  ;;  %v369_v9 = vrot.slane %v360_v3, %v368_v4 }
  0x7a   : > { %856 = vmatprep.subr.bf16.mxu0 %v855_v48  ;;  %872 = vmatprep.subr.bf16.mxu1 %v871_v50  ;;  %v489_v10 = vrot.slane %v480_v5, %v368_v4  ;;  %v485_v24 = vrot.slane %v480_v5, %v364_v2  ;;  %v834_v41 = vld [vmem:[%s327_s8] ss:$0 sm:$0xff] }
  0x7d   : > { %858 = vmatpush1.bf16.msra.mxu0 %v857_v55  ;;  %874 = vmatpush1.bf16.msra.mxu1 %v873_v56 }
  0x7e   : > { %876 = vmatprep.subr.bf16.mxu1 %v875_v57 }
  0x80   : > { %830 = vmatmul.mubr.msk.f32.vlgmr.msra.gmra.mrb[0].mxu0 %vm372_vm0, %v338_v60 }
  0x81   : > { %449 = vmatprep.mubr.f32.mxu0 %v1123_v0  ;;  %878 = vmatpush1.bf16.msra.mxu1 %v877_v61 }
  0x84   : > { %831 = vmatmul.mubr.msk.f32.gmra.mrb[2].mxu0 %vm372_vm0, %v339_v62  ;;  %832 = vmatmul.mubr.msk.f32.vlgmr.msra.gmra.mrb[0].mxu1 %vm372_vm0, %v338_v60 }
  0x85   : > { %568 = vmatprep.mubr.f32.mxu1 %v1123_v0 }
  0x88   : > { %833 = vmatmul.mubr.msk.f32.gmra.mrb[2].mxu1 %vm372_vm0, %v339_v62 }
 0x153   : > { %v445_v6 = vpop.f32.mrb[0].mxu0 }
 0x154   : > { %v447_v8 = vpop.f32.mrb[1].mxu0  ;;  %v446_v12 = vadd.f32 %v445_v6, %v365_v7 }
 0x155   : > { %v448_v16 = vadd.f32 %v447_v8, %v369_v9 }
 0x157   : > { %v451_v11 = vpop.f32.mrb[2].mxu0  ;;  %v564_v0 = vpop.f32.mrb[0].mxu1 }
 0x158   : > { %v452_v13 = vadd.f32 %v451_v11, %v365_v7  ;;  %v453_v14 = vpop.f32.mrb[3].mxu0  ;;  %v566_v15 = vpop.f32.mrb[1].mxu1  ;;  %v565_v26 = vadd.f32 %v564_v0, %v485_v24 }
 0x159   : > { %v454_v17 = vadd.f32 %v453_v14, %v369_v9  ;;  %v567_v18 = vadd.f32 %v566_v15, %v489_v10 }
 0x15a   : > { %v881_v19 = vpack.c.bf16 %v452_v13, %v446_v12 }
 0x15b   : > { %v879_v20 = vpack.c.bf16 %v454_v17, %v448_v16  ;;  %v570_v21 = vpop.f32.mrb[2].mxu1  ;;  %639 = vmatprep.mubr.f32.mxu0 %v567_v18 }
 0x15c   : > { %v572_v22 = vpop.f32.mrb[3].mxu1  ;;  %v571_v25 = vadd.f32 %v570_v21, %v485_v24 }
 0x15d   : > { %880 = vmatprep.subr.bf16.mxu0 %v879_v20  ;;  %883 = vmatprep.subr.bf16.mxu1 %v879_v20  ;;  %v573_v23 = vadd.f32 %v572_v22, %v489_v10 }
 0x15e   : > { %882 = vmatpush1.bf16.xpose.msra.mxu0 %v881_v19  ;;  %884 = vmatpush1.bf16.xpose.msra.mxu1 %v881_v19 }
 0x15f   : > { %644 = vmatprep.mubr.f32.mxu1 %v573_v23 }
 0x165   : > { %640 = vmatmul.mubr.f32.vlgmr.msra.gmra.mrb[4].mxu0 %v565_v26  ;;  %645 = vmatmul.mubr.f32.vlgmr.msra.gmra.mrb[4].mxu1 %v571_v25 }
 0x238   : > { %v641_v27 = vpop.f32.mrb[4].mxu0  ;;  %v646_v28 = vpop.f32.mrb[4].mxu1 }
 0x239   : > { %v650_v29 = vmul.f32 0.0625, %v641_v27  ;;  %v643_v30 = vpop.f32.mrb[5].mxu0  ;;  %v648_v31 = vpop.f32.mrb[5].mxu1  ;;  %v651_v32 = vmul.f32 0.0625, %v646_v28 }
 0x23b   : > { %v653_v33 = vsel %vm652_vm1, %v650_v29, -inf  ;;  %v656_v34 = vsel %vm652_vm1, %v651_v32, -inf }
 0x23c   : > { %654 = vmax.xlane.f32.xlu0 %v653_v33 }
 0x240   : > { %657 = vmax.xlane.f32.xlu0 %v656_v34 }
 0x2c9   : > { %v655_v35 = vpop.xlane.xlu0 %654 }
 0x2ca   : > { %v659_v36 = vsub.f32 %v650_v29, %v655_v35 }
 0x2cc   : > { %v661_v37 = vmul.f32 1.442695, %v659_v36 }
 0x2cd   : > { %v658_v38 = vpop.xlane.xlu0 %657 }
 0x2ce   : > { %966 = vpow2.f32 %v661_v37  ;;  %v660_v39 = vsub.f32 %v651_v32, %v658_v38 }
 0x2d0   : > { %v663_v40 = vmul.f32 1.442695, %v660_v39 }
 0x2d2   : > { %968 = vpow2.f32 %v663_v40 }
 0x2d8   : > { %v967_v42 = vpop.eup %966 }
 0x2d9   : > { %v680_v43 = vsel %vm652_vm1, %v967_v42, 0.0  ;;  %v672_v44 = vmul.f32 %v967_v42, %v834_v41 }
 0x2da   : > { %681 = vadd.xlane.f32.xlu1 %v680_v43 }
 0x2db   : > { %v674_v45 = vsel %vm652_vm1, %v672_v44, 0.0 }
 0x2dc   : > { %v969_v46 = vpop.eup %968  ;;  %675 = vadd.xlane.f32.xlu0 %v674_v45 }
 0x2dd   : > { %v683_v47 = vsel %vm652_vm1, %v969_v46, 0.0  ;;  %v673_v48 = vmul.f32 %v969_v46, %v834_v41 }
 0x2de   : > { %684 = vadd.xlane.f32.xlu1 %v683_v47 }
 0x2df   : > { %v677_v49 = vsel %vm652_vm1, %v673_v48, 0.0 }
 0x2e2   : > { %678 = vadd.xlane.f32.xlu1 %v677_v49 }
 0x367   : > { %v682_v50 = vpop.xlane.xlu1 %681 }
 0x368   : > { %970 = vrcp.f32 %v682_v50 }
 0x369   : > { %v676_v53 = vpop.xlane.xlu0 %675 }
 0x36b   : > { %v685_v51 = vpop.xlane.xlu1 %684 }
 0x36c   : > { %972 = vrcp.f32 %v685_v51 }
 0x36f   : > { %v679_v56 = vpop.xlane.xlu1 %678 }
 0x372   : > { %v971_v52 = vpop.eup %970 }
 0x373   : > { %v687_v54 = vmul.f32 %v971_v52, %v676_v53 }
 0x375   : > { %691 = vst.msk [vmem:[%s336_s21] sm:$0xff] %vm690_vm2, %v687_v54 }
 0x376   : > { %v973_v55 = vpop.eup %972 }
 0x377   : > { %v689_v57 = vmul.f32 %v973_v55, %v679_v56 }
 0x379   : > { %692 = vst.msk [vmem:[%s336_s21 + $0x8] sm:$0xff] %vm690_vm2, %v689_v57 }
 0x37a PF: > { %s20_s26 = sadd.s32 1, %s1114_s26   ;;  %s1397_s21 = smov %s1098_s22 }
 0x37b   : > { %p17_p9 = scmp.ge.s32.totalorder %s20_s26, 4   ;;  %s1398_s22 = smov %s1102_s23 }
 0x37c   : > { %s1399_s23 = smov %s1275_s14  ;;  %s1400_s24 = smov %s1110_s25 }
 0x37d   : > { %s1401_s25 = smov %s1403_s27  ;;  %19 = sbr.rel (!%p17_p9) target bundleno = 5 (0x5), region = 96 }
 0x384   :  { %723 = vsyncpa [#allocation3], 1 }
 0x385   :  { %725 = vsyncpa [#allocation3 + $0x1], 1 }
 0x386   :  { %726 = vsyncpa [#allocation5], 1 }

</bundles_post_ra>
